<compile_context>
chip_gen: v6e
topology: v6e:2x2x1
jax: 0.10.0
libtpu: 0.0.40
codegen_flags: <defaults>
</compile_context>

<pallas_src>
from functools import partial

import jax
import jax.numpy as jnp
from jax.experimental import pallas as pl
from jax.experimental.pallas import tpu as pltpu

BETA = 0.5
THRESHOLD = 1.0

LANE_WIDTH = 1024          # slab width: 8 x 128 lanes, lane-dense -> wide unmasked vst
TARGET_BLOCK_ROWS = 1024   # (1024, 1024) f32 = 4 MiB/array/block; 4 streams x 2 bufs = 32 MiB


def _leaky_kernel(inp_ref, mem_ref, spk_ref, mem_out_ref):
    # Upcast inside the kernel: VPU casts are free for a memory-bound op and the
    # DMAs stream the native (possibly narrow) dtype.
    mem = mem_ref[...].astype(jnp.float32)
    inp = inp_ref[...].astype(jnp.float32)
    # FastSigmoid.forward: heaviside of (mem - threshold), strict inequality.
    spk = ((mem - THRESHOLD) > 0.0).astype(jnp.float32)
    spk_ref[...] = spk.astype(spk_ref.dtype)          # spk is exactly {0,1} -> lossless
    # reset = spk - threshold  =>  mem' = beta*mem + inp - spk + threshold
    mem_out_ref[...] = (BETA * mem + inp - spk + THRESHOLD).astype(mem_out_ref.dtype)


def _elementwise_forward(inp, mem, spk_dtype, mem_dtype):
    """Plain-jnp path for the non-1024-aligned tail / degenerate tiny tensors."""
    mem_f = mem.astype(jnp.float32)
    inp_f = inp.astype(jnp.float32)
    spk = ((mem_f - THRESHOLD) > 0.0).astype(jnp.float32)
    mem_new = BETA * mem_f + inp_f - spk + THRESHOLD
    return spk.astype(spk_dtype), mem_new.astype(mem_dtype)


@partial(jax.jit, static_argnames=("spk_dtype",))
def leaky_sigmoid_surrogate(input_, mem, *, spk_dtype=None):
    """LeakySigmoidSurrogate forward. input_/mem: same shape (e.g. NCHW), float.

    Returns (spk, mem_new). spk defaults to input_.dtype (matches the module's
    `.float()` for f32 inputs; pass e.g. jnp.bfloat16/int8 to shave HBM traffic
    losslessly). mem_new matches mem.dtype.
    """
    assert input_.shape == mem.shape
    orig_shape = input_.shape
    n = input_.size
    if spk_dtype is None:
        spk_dtype = input_.dtype
    mem_dtype = mem.dtype

    w = LANE_WIDTH
    rows = n // w
    n_main = rows * w
    tail = n - n_main

    x_flat = input_.reshape(-1)
    m_flat = mem.reshape(-1)

    if rows == 0:
        # Tensor smaller than one lane-dense row: not worth a pallas_call.
        spk, mem_new = _elementwise_forward(x_flat, m_flat, spk_dtype, mem_dtype)
        return spk.reshape(orig_shape), mem_new.reshape(orig_shape)

    # Block rows: multiple of 8, sized so mid-size tensors still get >= ~4 grid
    # blocks (keeps both v7x TensorCores busy via "parallel"), capped at
    # TARGET_BLOCK_ROWS so double-buffered streams stay well inside v7x's
    # 64 MiB per-TC VMEM.
    if rows <= 2 * TARGET_BLOCK_ROWS:
        block_rows = min(rows, max(8, ((-(-rows // 4) + 7) // 8) * 8))
    else:
        block_rows = TARGET_BLOCK_ROWS
    grid = (pl.cdiv(rows, block_rows),)   # ragged last block handled by Pallas masking

    x2 = x_flat[:n_main].reshape(rows, w)     # contiguous prefix: no data movement
    m2 = m_flat[:n_main].reshape(rows, w)

    spec = pl.BlockSpec((block_rows, w), lambda i: (i, 0))

    spk2, mem2 = pl.pallas_call(
        _leaky_kernel,
        out_shape=(
            jax.ShapeDtypeStruct((rows, w), spk_dtype),
            jax.ShapeDtypeStruct((rows, w), mem_dtype),
        ),
        grid=grid,
        in_specs=[spec, spec],
        out_specs=(spec, spec),
        compiler_params=pltpu.CompilerParams(
            dimension_semantics=("parallel",),       # megacore sharding on v7x
            vmem_limit_bytes=48 * 1024 * 1024,       # safe on v5e/v6e/v7x
        ),
    )(x2, m2)

    spk_main = spk2.reshape(-1)
    mem_main = mem2.reshape(-1)

    if tail == 0:
        spk = spk_main
        mem_new = mem_main
    else:
        spk_tail, mem_tail = _elementwise_forward(
            x_flat[n_main:], m_flat[n_main:], spk_dtype, mem_dtype)
        spk = jnp.concatenate([spk_main, spk_tail])
        mem_new = jnp.concatenate([mem_main, mem_tail])

    return spk.reshape(orig_shape), mem_new.reshape(orig_shape)


def _reference(input_, mem):
    spk = ((mem - THRESHOLD) > 0.0).astype(jnp.float32)
    reset = spk - THRESHOLD
    mem_new = BETA * mem + input_ - reset
    return spk, mem_new


if __name__ == "__main__":
    key = jax.random.PRNGKey(0)
    k1, k2, k3, k4, k5, k6 = jax.random.split(key, 6)

    # 1) SNN-layer-like shape: batch=2, channels=4, 16x16 spatial (n = 2048, no tail).
    x = jax.random.normal(k1, (2, 4, 16, 16), dtype=jnp.float32)
    mem = jax.random.normal(k2, (2, 4, 16, 16), dtype=jnp.float32) + 0.5
    spk, mem_new = leaky_sigmoid_surrogate(x, mem)
    jax.block_until_ready((spk, mem_new))
    spk_ref, mem_ref = _reference(x, mem)
    assert spk.dtype == jnp.float32 and mem_new.dtype == jnp.float32
    assert jnp.array_equal(spk, spk_ref), "spk mismatch"
    assert jnp.allclose(mem_new, mem_ref, atol=1e-6), "mem mismatch"

    # 2) Non-1024-divisible shape -> exercises the aligned-prefix + jnp-tail path.
    x2 = jax.random.normal(k3, (2, 3, 17, 19), dtype=jnp.float32)
    mem2 = jax.random.normal(k4, (2, 3, 17, 19), dtype=jnp.float32) + 0.5
    spk2, mem2_new = leaky_sigmoid_surrogate(x2, mem2)
    jax.block_until_ready((spk2, mem2_new))
    spk2_ref, mem2_ref = _reference(x2, mem2)
    assert jnp.array_equal(spk2, spk2_ref), "spk mismatch (tail path)"
    assert jnp.allclose(mem2_new, mem2_ref, atol=1e-6), "mem mismatch (tail path)"

    # 3) Shape with a multi-block grid (rows=32 -> 4 blocks) to exercise megacore path.
    x3 = jax.random.normal(k5, (4, 8, 32, 32), dtype=jnp.float32)
    mem3 = jax.random.normal(k6, (4, 8, 32, 32), dtype=jnp.float32) + 0.5
    spk3, mem3_new = leaky_sigmoid_surrogate(x3, mem3)
    jax.block_until_ready((spk3, mem3_new))
    spk3_ref, mem3_ref = _reference(x3, mem3)
    assert jnp.array_equal(spk3, spk3_ref), "spk mismatch (multi-block)"
    assert jnp.allclose(mem3_new, mem3_ref, atol=1e-6), "mem mismatch (multi-block)"

    print("KERNEL_OK")
</pallas_src>

<mosaic_0001>
module attributes {stable_mosaic.version = 11 : i64} {
  func.func @_leaky_kernel(%arg0: i32, %arg1: memref<2x1024xf32, #tpu.memory_space<vmem>>, %arg2: memref<2x1024xf32, #tpu.memory_space<vmem>>, %arg3: memref<2x1024xf32, #tpu.memory_space<vmem>>, %arg4: memref<2x1024xf32, #tpu.memory_space<vmem>>) attributes {dimension_semantics = [#tpu.dimension_semantics<parallel>], iteration_bounds = array<i64: 1>, scalar_prefetch = 0 : i64, scratch_operands = 0 : i64, tpu.core_type = #tpu.core_type<tc>, window_params = [{transform_indices = @transform_0, window_bounds = array<i64: 2, 1024>}, {transform_indices = @transform_1, window_bounds = array<i64: 2, 1024>}, {transform_indices = @transform_2, window_bounds = array<i64: 2, 1024>}, {transform_indices = @transform_3, window_bounds = array<i64: 2, 1024>}]} {
    %c0 = arith.constant 0 : index
    %c0_0 = arith.constant 0 : index
    %0 = vector.load %arg2[%c0, %c0_0] : memref<2x1024xf32, #tpu.memory_space<vmem>>, vector<2x1024xf32>
    %c0_1 = arith.constant 0 : index
    %c0_2 = arith.constant 0 : index
    %1 = vector.load %arg1[%c0_1, %c0_2] : memref<2x1024xf32, #tpu.memory_space<vmem>>, vector<2x1024xf32>
    %cst = arith.constant 1.000000e+00 : f32
    %2 = vector.broadcast %cst : f32 to vector<2x1024xf32>
    %3 = arith.subf %0, %2 : vector<2x1024xf32>
    %cst_3 = arith.constant 0.000000e+00 : f32
    %4 = vector.broadcast %cst_3 : f32 to vector<2x1024xf32>
    %5 = arith.cmpf ogt, %3, %4 : vector<2x1024xf32>
    %6 = arith.extui %5 : vector<2x1024xi1> to vector<2x1024xi32>
    %7 = arith.sitofp %6 : vector<2x1024xi32> to vector<2x1024xf32>
    %c0_4 = arith.constant 0 : index
    %c0_5 = arith.constant 0 : index
    %8 = vector.load %arg3[%c0_4, %c0_5] : memref<2x1024xf32, #tpu.memory_space<vmem>>, vector<2x1024xf32>
    tpu.vector_store %arg3[%c0_4, %c0_5], %7 {strides = array<i32>} : memref<2x1024xf32, #tpu.memory_space<vmem>>, vector<2x1024xf32>,
    %cst_6 = arith.constant 5.000000e-01 : f32
    %9 = vector.broadcast %cst_6 : f32 to vector<2x1024xf32>
    %10 = arith.mulf %9, %0 : vector<2x1024xf32>
    %11 = arith.addf %10, %1 : vector<2x1024xf32>
    %12 = arith.subf %11, %7 : vector<2x1024xf32>
    %cst_7 = arith.constant 1.000000e+00 : f32
    %13 = vector.broadcast %cst_7 : f32 to vector<2x1024xf32>
    %14 = arith.addf %12, %13 : vector<2x1024xf32>
    %c0_8 = arith.constant 0 : index
    %c0_9 = arith.constant 0 : index
    %15 = vector.load %arg4[%c0_8, %c0_9] : memref<2x1024xf32, #tpu.memory_space<vmem>>, vector<2x1024xf32>
    tpu.vector_store %arg4[%c0_8, %c0_9], %14 {strides = array<i32>} : memref<2x1024xf32, #tpu.memory_space<vmem>>, vector<2x1024xf32>,
    return
  }
  func.func @transform_0(%arg0: i32) -> (i32, i32) {
    %c0_i32 = arith.constant 0 : i32
    %c0_i32_0 = arith.constant 0 : i32
    return %arg0, %c0_i32 : i32, i32
  }
  func.func @transform_1(%arg0: i32) -> (i32, i32) {
    %c0_i32 = arith.constant 0 : i32
    %c0_i32_0 = arith.constant 0 : i32
    return %arg0, %c0_i32 : i32, i32
  }
  func.func @transform_2(%arg0: i32) -> (i32, i32) {
    %c0_i32 = arith.constant 0 : i32
    %c0_i32_0 = arith.constant 0 : i32
    return %arg0, %c0_i32 : i32, i32
  }
  func.func @transform_3(%arg0: i32) -> (i32, i32) {
    %c0_i32 = arith.constant 0 : i32
    %c0_i32_0 = arith.constant 0 : i32
    return %arg0, %c0_i32 : i32, i32
  }
}

</mosaic_0001>

<bundles_post_ra>
// kernel: leaky_sigmoid_surrogate.1
= control target key start
LH: loop header
LB: loop body
LE: loop exit
PB: predicated region body
PF: predicated region fallthrough
CT: control target
= control target key end

     0   :  { %v50_v10 = vmov 0.0   ;;  %s95_s0 = inlined_call_operand.vmem [shape: f32[2,1024], index: 0, kind: input, shape index: {}]   ;;  %s96_s1 = inlined_call_operand.vmem [shape: f32[2,1024], index: 1, kind: input, shape index: {}]   ;;  %s97_s2 = inlined_call_operand.vmem [shape: f32[2,1024], index: 2, kind: output, shape index: {0}]   ;;  %s98_s3 = inlined_call_operand.vmem [shape: f32[2,1024], index: 3, kind: output, shape index: {1}]  }
   0x1   :  { %v13_v0 = vld [vmem:[%s96_s1] sm:$0xff]  ;;  %v14_v2 = vld [vmem:[%s96_s1 + $0x8] sm:$0xff] }
   0x2   :  { %v15_v1 = vld [vmem:[%s95_s0] sm:$0xff]  ;;  %v45_v3 = vadd.f32 -1.0, %v13_v0  ;;  %v27_v4 = vmul.f32 0.5, %v13_v0  ;;  %v16_v5 = vld [vmem:[%s95_s0 + $0x8] sm:$0xff]  ;;  %v46_v6 = vadd.f32 -1.0, %v14_v2  ;;  %v28_v7 = vmul.f32 0.5, %v14_v2 }
   0x4   :  { %vm19_vm0 = vcmp.gt.f32.partialorder %v45_v3, 0.0  ;;  %v29_v8 = vadd.f32 %v27_v4, %v15_v1  ;;  %vm20_vm1 = vcmp.gt.f32.partialorder %v46_v6, 0.0  ;;  %v30_v9 = vadd.f32 %v28_v7, %v16_v5 }
   0x5   :  { %v47_v11 = vsel %vm19_vm0, 1.0, %v50_v10  ;;  %v48_v12 = vsel %vm20_vm1, 1.0, %v50_v10 }
   0x6   :  { %25 = vst [vmem:[%s97_s2] sm:$0xff] %v47_v11  ;;  %v31_v13 = vsub.f32 %v29_v8, %v47_v11  ;;  %26 = vst [vmem:[%s97_s2 + $0x8] sm:$0xff] %v48_v12  ;;  %v32_v14 = vsub.f32 %v30_v9, %v48_v12 }
   0x8   :  { %v33_v15 = vadd.f32 1.0, %v31_v13  ;;  %v34_v16 = vadd.f32 1.0, %v32_v14 }
   0xa   :  { %35 = vst [vmem:[%s98_s3] sm:$0xff] %v33_v15  ;;  %36 = vst [vmem:[%s98_s3 + $0x8] sm:$0xff] %v34_v16 }

</bundles_post_ra>
